<compile_context>
chip_gen: v7x
topology: tpu7x:2x2x1
jax: 0.10.0
libtpu: 0.0.40
codegen_flags: <defaults>
</compile_context>

<pallas_src>
import jax
import jax.numpy as jnp
from jax.experimental import pallas as pl
from jax.experimental.pallas import tpu as pltpu

NHIST = 4
N = 2 + NHIST            # stress + history + damage = 6
NROWS = 4 + N            # packed input rows: [rate, base, T, ctrl, y_0..y_{N-1}]
MAX_BLOCK_B = 2048       # lane-dense batch chunk cap (multiple of 128)


def _round_up(x, m):
    return (x + m - 1) // m * m


def _choose_block_b(batch):
    """Pick a lane block: big (amortize ~0.35us/step overhead) but with >= 2
    grid steps when the batch allows it, so both v7x TensorCores get work."""
    if batch <= 128:
        return 128
    blk = _round_up((batch + 1) // 2, 128)
    return min(blk, MAX_BLOCK_B)


def both_model_kernel(in_ref, par_ref, rates_ref):
    # in_ref   : (4+N, Bblk) lane-dense slab: rows [rate, base, T, ctrl, y_0..y_{N-1}]
    # par_ref  : (N, N+3)    cols 0..N-1 = A, col N = b, col N+1 = c, col N+2 = bias
    # rates_ref: (N, Bblk)   lane-dense output
    par = par_ref[...]                   # (N, N+3), constant block -> fetched once
    A = par[:, :N]                       # (N, N)
    b_col = par[:, N:N + 1]              # (N, 1)  d ydot / d erate
    c_col = par[:, N + 1:N + 2]          # (N, 1)  d ydot / d T
    bias_col = par[:, N + 2:N + 3]       # (N, 1)

    rate = in_ref[0:1, :]                # controlled-quantity rate
    base = in_ref[1:2, :]                # controlled-quantity base (stress under stress ctrl)
    T = in_ref[2:3, :]
    ctrl = in_ref[3:4, :]

    # common = A @ y + c*T + bias  — shared by both control branches.
    # Unrolled broadcast FMAs on the full (N, Bblk) tile (K = 6: skip the MXU).
    common = c_col * T + bias_col
    for k in range(N):
        common = common + A[:, k:k + 1] * in_ref[4 + k:5 + k, :]

    is_s = ctrl > 0.5                    # stress-controlled lanes (ctrl == 1)
    delta0 = base - in_ref[4:5, :]       # controlled stress minus current stress row

    # Newton solve for the strain rate under stress control.  The surrogate is
    # linear in erate, so a single step from erate_guess = 0 is exact:
    #   R(e) = ydot(yp, e)[0] - rate = (common[0] + A[0,0]*delta0) + Je0*e - rate
    inv_Je0 = pl.reciprocal(b_col[0:1, 0:1])
    erate = (rate - common[0:1, :] - A[0:1, 0:1] * delta0) * inv_Je0

    # Paste both branches with one select:
    #   strain ctrl : ydot_e = common + b*rate
    #   stress ctrl : ydot_s = common + A[:,0]*delta0 + b*erate   (rows >= 1)
    eff_rate = jnp.where(is_s, erate, rate)
    s_mask = is_s.astype(jnp.float32)
    rates = common + b_col * eff_rate + A[:, 0:1] * (s_mask * delta0)
    rates_ref[...] = rates
    # stress-controlled lanes report the solved strain rate in row 0
    rates_ref[0:1, :] = jnp.where(is_s, erate, rates[0:1, :])


def both_rates_lane_dense(slab, params, *, block_b=None):
    """Lane-dense rate evaluation.

    slab   : (4+N, B) f32, rows [rate, base, T, ctrl, y_0..y_{N-1}]
    params : (N, N+3) f32
    returns: (N, B) f32 rates (lane-dense).

    Keep `slab` in this layout across integrator time steps so no per-call
    transpose/stack/pad is needed.
    """
    nrows, batch = slab.shape
    assert nrows == NROWS
    if block_b is None:
        block_b = _choose_block_b(batch)
    bp = _round_up(batch, block_b)
    if bp != batch:
        # pad lanes get ctrl = 0 (strain branch) — harmless, sliced off below
        slab = jnp.pad(slab, ((0, 0), (0, bp - batch)))

    rates = pl.pallas_call(
        both_model_kernel,
        out_shape=jax.ShapeDtypeStruct((N, bp), jnp.float32),
        grid=(bp // block_b,),
        in_specs=[
            pl.BlockSpec((NROWS, block_b), lambda i: (0, i)),
            pl.BlockSpec((N, N + 3), lambda i: (0, 0)),
        ],
        out_specs=pl.BlockSpec((N, block_b), lambda i: (0, i)),
        compiler_params=pltpu.CompilerParams(
            dimension_semantics=("parallel",)),
    )(slab, params)

    return rates[:, :batch] if bp != batch else rates


def both_based_model(y, rate_t, base_t, T_t, control, A, b, c, bias,
                     block_b=None):
    """BothBasedModel.forward equivalent: returns (rates (B,N), jacs (B,N,N)).

    Row-major convenience wrapper.  TODO(synk): inside the real integrator keep
    the state/controls lane-dense and call `both_rates_lane_dense` directly so
    the transpose/stack below never runs per rate evaluation.
    """
    bsz, n = y.shape
    assert n == N

    slab = jnp.concatenate(
        [jnp.stack([rate_t, base_t, T_t, control.astype(jnp.float32)], axis=0),
         jnp.asarray(y, jnp.float32).T],
        axis=0).astype(jnp.float32)                                  # (4+N, B)
    params = jnp.concatenate(
        [A, b[:, None], c[:, None], bias[:, None]], axis=1
    ).astype(jnp.float32)                                            # (N, N+3)

    rates = both_rates_lane_dense(slab, params, block_b=block_b).T   # (B, N)

    # Jacobians are batch-independent for the linear surrogate: build the two
    # candidate matrices and do a single-pass per-experiment select (no zeros
    # intermediate, no double where).
    # TODO(synk): for a nonlinear InelasticModel, J depends on y per batch
    # element; the integrator should then consume (J_e, J_s, control) lazily
    # instead of materializing the (B, N, N) slab at all.
    Je0 = b[0]
    J_e = A
    # pyoptmat StressBasedModel surgery: J[0,:] := -J[0,:]/Je0 then J[:,0] := 0
    J_s = A.at[0, :].set(-A[0, :] / Je0).at[:, 0].set(0.0)
    is_s = (control == 1)[:, None, None]
    jacs = jnp.where(is_s, J_s[None, :, :], J_e[None, :, :])
    return rates, jacs


def _reference(y, rate_t, base_t, T_t, control, A, b, c, bias):
    """Pure-JAX reference mirroring BothBasedModel.forward."""
    bsz = y.shape[0]
    Tterm = T_t[:, None] * c[None, :] + bias[None, :]

    def ydot(yy, erate):
        return yy @ A.T + erate[:, None] * b[None, :] + Tterm

    # strain control
    ydot_e = ydot(y, rate_t)
    J_e = jnp.broadcast_to(A[None], (bsz, N, N))

    # stress control (linear model -> one exact Newton step)
    yp = y.at[:, 0].set(base_t)
    Je0 = b[0]
    erate = (rate_t - ydot(yp, jnp.zeros(bsz))[:, 0]) / Je0
    ydot_s = ydot(yp, erate).at[:, 0].set(erate)
    J_s = A.at[0, :].set(-A[0, :] / Je0).at[:, 0].set(0.0)
    J_s = jnp.broadcast_to(J_s[None], (bsz, N, N))

    e = (control == 0)[:, None]
    s = (control == 1)[:, None]
    rates = jnp.where(e, ydot_e, 0.0)
    rates = jnp.where(s, ydot_s, rates)
    jacs = jnp.where(e[:, :, None], J_e, 0.0)
    jacs = jnp.where(s[:, :, None], J_s, jacs)
    return rates, jacs


if __name__ == "__main__":
    key = jax.random.PRNGKey(0)
    k1, k2, k3, k4, k5 = jax.random.split(key, 5)

    # deterministic synthetic model parameters
    A = 0.1 * jax.random.normal(k1, (N, N), jnp.float32)
    b = 0.1 * jax.random.normal(k2, (N,), jnp.float32)
    b = b.at[0].set(1.5)                      # keep Je[:, 0] away from zero
    c = 0.01 * jax.random.normal(k3, (N,), jnp.float32)
    bias = 0.1 * jax.random.normal(k4, (N,), jnp.float32)

    # a batch of experiments (lane-dense; block chooser gives a 2-step grid)
    B = 512
    y = jax.random.normal(k5, (B, N), jnp.float32)
    t = jnp.linspace(0.0, 1.0, B, dtype=jnp.float32)
    rate_t = 0.1 + 0.05 * t                   # rate_fn(t)
    base_t = 2.0 * t                          # base_fn(t)  (controlled stress)
    T_t = 300.0 + 10.0 * t                    # T_fn(t)
    control = (jnp.arange(B) % 2).astype(jnp.int32)   # alternate strain/stress

    rates, jacs = both_based_model(y, rate_t, base_t, T_t, control, A, b, c, bias)
    jax.block_until_ready((rates, jacs))

    rates_ref, jacs_ref = _reference(y, rate_t, base_t, T_t, control, A, b, c, bias)
    assert jnp.allclose(rates, rates_ref, rtol=1e-5, atol=1e-5), "rates mismatch"
    assert jnp.allclose(jacs, jacs_ref, rtol=1e-5, atol=1e-5), "jacs mismatch"

    print("KERNEL_OK")
</pallas_src>

<mosaic_0001>
module attributes {stable_mosaic.version = 11 : i64} {
  func.func @both_model_kernel(%arg0: i32, %arg1: memref<10x256xf32, #tpu.memory_space<vmem>>, %arg2: memref<6x9xf32, #tpu.memory_space<vmem>>, %arg3: memref<6x256xf32, #tpu.memory_space<vmem>>) attributes {dimension_semantics = [#tpu.dimension_semantics<parallel>], iteration_bounds = array<i64: 2>, scalar_prefetch = 0 : i64, scratch_operands = 0 : i64, tpu.core_type = #tpu.core_type<tc>, window_params = [{transform_indices = @transform_0, window_bounds = array<i64: 10, 256>}, {pipeline_mode = #tpu.pipeline_mode<synchronous>, transform_indices = @transform_1, window_bounds = array<i64: 6, 9>}, {transform_indices = @transform_2, window_bounds = array<i64: 6, 256>}]} {
    %c0 = arith.constant 0 : index
    %c0_0 = arith.constant 0 : index
    %0 = vector.load %arg2[%c0, %c0_0] : memref<6x9xf32, #tpu.memory_space<vmem>>, vector<6x9xf32>
    %1 = vector.extract_strided_slice %0 {offsets = [0, 0], sizes = [6, 6], strides = [1, 1]} : vector<6x9xf32> to vector<6x6xf32>
    %2 = vector.extract_strided_slice %0 {offsets = [0, 6], sizes = [6, 1], strides = [1, 1]} : vector<6x9xf32> to vector<6x1xf32>
    %3 = vector.extract_strided_slice %0 {offsets = [0, 7], sizes = [6, 1], strides = [1, 1]} : vector<6x9xf32> to vector<6x1xf32>
    %4 = vector.extract_strided_slice %0 {offsets = [0, 8], sizes = [6, 1], strides = [1, 1]} : vector<6x9xf32> to vector<6x1xf32>
    %c0_1 = arith.constant 0 : index
    %c0_2 = arith.constant 0 : index
    %5 = vector.load %arg1[%c0_1, %c0_2] : memref<10x256xf32, #tpu.memory_space<vmem>>, vector<1x256xf32>
    %c1 = arith.constant 1 : index
    %c0_3 = arith.constant 0 : index
    %6 = vector.load %arg1[%c1, %c0_3] : memref<10x256xf32, #tpu.memory_space<vmem>>, vector<1x256xf32>
    %c2 = arith.constant 2 : index
    %c0_4 = arith.constant 0 : index
    %7 = vector.load %arg1[%c2, %c0_4] : memref<10x256xf32, #tpu.memory_space<vmem>>, vector<1x256xf32>
    %c3 = arith.constant 3 : index
    %c0_5 = arith.constant 0 : index
    %8 = vector.load %arg1[%c3, %c0_5] : memref<10x256xf32, #tpu.memory_space<vmem>>, vector<1x256xf32>
    %9 = vector.broadcast %3 : vector<6x1xf32> to vector<6x256xf32>
    %10 = vector.broadcast %7 : vector<1x256xf32> to vector<6x256xf32>
    %11 = arith.mulf %9, %10 : vector<6x256xf32>
    %12 = vector.broadcast %4 : vector<6x1xf32> to vector<6x256xf32>
    %13 = arith.addf %11, %12 : vector<6x256xf32>
    %14 = vector.extract_strided_slice %1 {offsets = [0, 0], sizes = [6, 1], strides = [1, 1]} : vector<6x6xf32> to vector<6x1xf32>
    %c4 = arith.constant 4 : index
    %c0_6 = arith.constant 0 : index
    %15 = vector.load %arg1[%c4, %c0_6] : memref<10x256xf32, #tpu.memory_space<vmem>>, vector<1x256xf32>
    %16 = vector.broadcast %14 : vector<6x1xf32> to vector<6x256xf32>
    %17 = vector.broadcast %15 : vector<1x256xf32> to vector<6x256xf32>
    %18 = arith.mulf %16, %17 : vector<6x256xf32>
    %19 = arith.addf %13, %18 : vector<6x256xf32>
    %20 = vector.extract_strided_slice %1 {offsets = [0, 1], sizes = [6, 1], strides = [1, 1]} : vector<6x6xf32> to vector<6x1xf32>
    %c5 = arith.constant 5 : index
    %c0_7 = arith.constant 0 : index
    %21 = vector.load %arg1[%c5, %c0_7] : memref<10x256xf32, #tpu.memory_space<vmem>>, vector<1x256xf32>
    %22 = vector.broadcast %20 : vector<6x1xf32> to vector<6x256xf32>
    %23 = vector.broadcast %21 : vector<1x256xf32> to vector<6x256xf32>
    %24 = arith.mulf %22, %23 : vector<6x256xf32>
    %25 = arith.addf %19, %24 : vector<6x256xf32>
    %26 = vector.extract_strided_slice %1 {offsets = [0, 2], sizes = [6, 1], strides = [1, 1]} : vector<6x6xf32> to vector<6x1xf32>
    %c6 = arith.constant 6 : index
    %c0_8 = arith.constant 0 : index
    %27 = vector.load %arg1[%c6, %c0_8] : memref<10x256xf32, #tpu.memory_space<vmem>>, vector<1x256xf32>
    %28 = vector.broadcast %26 : vector<6x1xf32> to vector<6x256xf32>
    %29 = vector.broadcast %27 : vector<1x256xf32> to vector<6x256xf32>
    %30 = arith.mulf %28, %29 : vector<6x256xf32>
    %31 = arith.addf %25, %30 : vector<6x256xf32>
    %32 = vector.extract_strided_slice %1 {offsets = [0, 3], sizes = [6, 1], strides = [1, 1]} : vector<6x6xf32> to vector<6x1xf32>
    %c7 = arith.constant 7 : index
    %c0_9 = arith.constant 0 : index
    %33 = vector.load %arg1[%c7, %c0_9] : memref<10x256xf32, #tpu.memory_space<vmem>>, vector<1x256xf32>
    %34 = vector.broadcast %32 : vector<6x1xf32> to vector<6x256xf32>
    %35 = vector.broadcast %33 : vector<1x256xf32> to vector<6x256xf32>
    %36 = arith.mulf %34, %35 : vector<6x256xf32>
    %37 = arith.addf %31, %36 : vector<6x256xf32>
    %38 = vector.extract_strided_slice %1 {offsets = [0, 4], sizes = [6, 1], strides = [1, 1]} : vector<6x6xf32> to vector<6x1xf32>
    %c8 = arith.constant 8 : index
    %c0_10 = arith.constant 0 : index
    %39 = vector.load %arg1[%c8, %c0_10] : memref<10x256xf32, #tpu.memory_space<vmem>>, vector<1x256xf32>
    %40 = vector.broadcast %38 : vector<6x1xf32> to vector<6x256xf32>
    %41 = vector.broadcast %39 : vector<1x256xf32> to vector<6x256xf32>
    %42 = arith.mulf %40, %41 : vector<6x256xf32>
    %43 = arith.addf %37, %42 : vector<6x256xf32>
    %44 = vector.extract_strided_slice %1 {offsets = [0, 5], sizes = [6, 1], strides = [1, 1]} : vector<6x6xf32> to vector<6x1xf32>
    %c9 = arith.constant 9 : index
    %c0_11 = arith.constant 0 : index
    %45 = vector.load %arg1[%c9, %c0_11] : memref<10x256xf32, #tpu.memory_space<vmem>>, vector<1x256xf32>
    %46 = vector.broadcast %44 : vector<6x1xf32> to vector<6x256xf32>
    %47 = vector.broadcast %45 : vector<1x256xf32> to vector<6x256xf32>
    %48 = arith.mulf %46, %47 : vector<6x256xf32>
    %49 = arith.addf %43, %48 : vector<6x256xf32>
    %cst = arith.constant 5.000000e-01 : f32
    %50 = vector.broadcast %cst : f32 to vector<1x256xf32>
    %51 = arith.cmpf ogt, %8, %50 : vector<1x256xf32>
    %c4_12 = arith.constant 4 : index
    %c0_13 = arith.constant 0 : index
    %52 = vector.load %arg1[%c4_12, %c0_13] : memref<10x256xf32, #tpu.memory_space<vmem>>, vector<1x256xf32>
    %53 = arith.subf %6, %52 : vector<1x256xf32>
    %54 = vector.extract_strided_slice %2 {offsets = [0, 0], sizes = [1, 1], strides = [1, 1]} : vector<6x1xf32> to vector<1x1xf32>
    %55 = tpu.reciprocal %54 : vector<1x1xf32> -> vector<1x1xf32>
    %56 = vector.extract_strided_slice %49 {offsets = [0, 0], sizes = [1, 256], strides = [1, 1]} : vector<6x256xf32> to vector<1x256xf32>
    %57 = arith.subf %5, %56 : vector<1x256xf32>
    %58 = vector.extract_strided_slice %1 {offsets = [0, 0], sizes = [1, 1], strides = [1, 1]} : vector<6x6xf32> to vector<1x1xf32>
    %59 = vector.broadcast %58 : vector<1x1xf32> to vector<1x256xf32>
    %60 = arith.mulf %59, %53 : vector<1x256xf32>
    %61 = arith.subf %57, %60 : vector<1x256xf32>
    %62 = vector.broadcast %55 : vector<1x1xf32> to vector<1x256xf32>
    %63 = arith.mulf %61, %62 : vector<1x256xf32>
    %64 = arith.select %51, %63, %5 : vector<1x256xi1>, vector<1x256xf32>
    %65 = arith.extui %51 : vector<1x256xi1> to vector<1x256xi32>
    %66 = arith.sitofp %65 : vector<1x256xi32> to vector<1x256xf32>
    %67 = vector.broadcast %2 : vector<6x1xf32> to vector<6x256xf32>
    %68 = vector.broadcast %64 : vector<1x256xf32> to vector<6x256xf32>
    %69 = arith.mulf %67, %68 : vector<6x256xf32>
    %70 = arith.addf %49, %69 : vector<6x256xf32>
    %71 = vector.extract_strided_slice %1 {offsets = [0, 0], sizes = [6, 1], strides = [1, 1]} : vector<6x6xf32> to vector<6x1xf32>
    %72 = arith.mulf %66, %53 : vector<1x256xf32>
    %73 = vector.broadcast %71 : vector<6x1xf32> to vector<6x256xf32>
    %74 = vector.broadcast %72 : vector<1x256xf32> to vector<6x256xf32>
    %75 = arith.mulf %73, %74 : vector<6x256xf32>
    %76 = arith.addf %70, %75 : vector<6x256xf32>
    %c0_14 = arith.constant 0 : index
    %c0_15 = arith.constant 0 : index
    %77 = vector.load %arg3[%c0_14, %c0_15] : memref<6x256xf32, #tpu.memory_space<vmem>>, vector<6x256xf32>
    tpu.vector_store %arg3[%c0_14, %c0_15], %76 {strides = array<i32>} : memref<6x256xf32, #tpu.memory_space<vmem>>, vector<6x256xf32>,
    %78 = vector.extract_strided_slice %76 {offsets = [0, 0], sizes = [1, 256], strides = [1, 1]} : vector<6x256xf32> to vector<1x256xf32>
    %79 = arith.select %51, %63, %78 : vector<1x256xi1>, vector<1x256xf32>
    %c0_16 = arith.constant 0 : index
    %c0_17 = arith.constant 0 : index
    %80 = vector.load %arg3[%c0_16, %c0_17] : memref<6x256xf32, #tpu.memory_space<vmem>>, vector<1x256xf32>
    tpu.vector_store %arg3[%c0_16, %c0_17], %79 {strides = array<i32>} : memref<6x256xf32, #tpu.memory_space<vmem>>, vector<1x256xf32>,
    return
  }
  func.func @transform_0(%arg0: i32) -> (i32, i32) {
    %c0_i32 = arith.constant 0 : i32
    %c0_i32_0 = arith.constant 0 : i32
    return %c0_i32, %arg0 : i32, i32
  }
  func.func @transform_1(%arg0: i32) -> (i32, i32) {
    %c0_i32 = arith.constant 0 : i32
    %c0_i32_0 = arith.constant 0 : i32
    %c0_i32_1 = arith.constant 0 : i32
    return %c0_i32, %c0_i32_0 : i32, i32
  }
  func.func @transform_2(%arg0: i32) -> (i32, i32) {
    %c0_i32 = arith.constant 0 : i32
    %c0_i32_0 = arith.constant 0 : i32
    return %c0_i32, %arg0 : i32, i32
  }
}

</mosaic_0001>

<bundles_post_ra>
// kernel: tpu_custom_call.1
= control target key start
LH: loop header
LB: loop body
LE: loop exit
PB: predicated region body
PF: predicated region fallthrough
CT: control target
= control target key end

     0   :  { %7 = vsyncpa [#allocation3], 0  ;;  %s1084_s0 = inlined_call_operand.hbm [shape: f32[10,512], index: 0, kind: input, shape index: {}]   ;;  %s1085_s1 = inlined_call_operand.hbm [shape: f32[6,9], index: 1, kind: input, shape index: {}]   ;;  %s1086_s2 = inlined_call_operand.hbm [shape: f32[6,512], index: 2, kind: output, shape index: {}]  }
   0x1   :  { %9 = vsyncpa [#allocation3 + $0x1], 0 }
   0x2   :  { %10 = vsyncpa [#allocation6], 0 }
   0x3   :  { %11 = vsyncpa [#allocation4], 0 }
   0x4   :  { %13 = vsyncpa [#allocation4 + $0x1], 0  ;;  %s832_s9 = smov 0   ;;  %s834_s10 = smov 0  }
   0x5   :  { %s836_s11 = smov 0   ;;  %s838_s12 = smov 0  }
   0x6 LB: > { %s853_s13 = sadd.s32 4294967295, %s798_s12   ;;  %s559_s14 = sadd.s32 4294967294, %s798_s12   ;;  %s798_s12 = sphi %s838_s12, %s1111_s12   ;;  %s794_s11 = sphi %s836_s11, %s1110_s11   ;;  %s790_s10 = sphi %s834_s10, %s1109_s10   ;;  %s786_s9 = sphi %s832_s9, %s1108_s9  }
   0x7   : > { %s857_s15 = sadd.s32 1, %s798_s12   ;;  %s26_s16 = sadd.s32 1, %s794_s11 }
   0x8   : > { %s23_s17 = ssub.s32 %s798_s12, %s857_s15  ;;  %p33_p0 = scmp.ne.s32.totalorder %s794_s11, %s790_s10 }
   0x9   : > { %p24_p1 = scmp.eq.s32.totalorder %s23_s17, 0  ;;  %p34_p2 = scmp.eq.s32.totalorder %s798_s12, 0 }
   0xa   : > { %p39_p3 = scmp.ne.s32.totalorder %s790_s10, %s786_s9  ;;  %p1087_p4 = scmp.eq.s32.totalorder %s853_s13, 0 }
   0xb   : > { %s869_s18 = scalar_select %p24_p1, %s794_s11, %s26_s16  }
   0xc   : > { %p871_p5 = por %p34_p2, %p33_p0  ;;  %p877_p6 = por %p1087_p4, %p39_p3 }
   0xd   : > { %p84_p7 = scmp.eq.s32.totalorder %s853_s13, 1  ;;  %p90_p8 = scmp.eq.s32.totalorder %s559_s14, 1 }
   0xe   : > { %s1093_s20 = scalar_select %p877_p6, 1, 0 }
   0xf   : > { %p560_p9 = scmp.ge.s32.totalorder %s798_s12, 1  ;;  %p97_p10 = scmp.lt.s32.totalorder %s798_s12, 3 }
  0x10   : > { %p884_p11 = por %p84_p7, %p33_p0  ;;  %p888_p12 = por %p90_p8, %p39_p3 }
  0x11   : > { %p892_p13 = pnand %p560_p9, %p97_p10  ;;  %s800_s24 = smov [#allocation5]  }
  0x12   : > { %s1094_s21 = scalar_select %p884_p11, 1, 0 }
  0x13   : > { %s1095_s22 = scalar_select %p888_p12, 1, 0 }
  0x14   : > { %s1096_s23 = scalar_select %p892_p13, 1, 0 }
  0x15   : > { %p595_p2 = pneg %p892_p13  ;;  %s110_s25 = sshll.u32 %s800_s24, 4  ;;  %s111_s25 = int_to_ptr.vmem [resolvable:$true] %s110_s25 }
  0x16   : > { %p608_p4 = scmp.lt.s32.totalorder %s798_s12, 2  ;;  %p1097_p0 = scmp.eq.s32.totalorder %s853_s13, 0 }
  0x17   : > { %s121_s27 = sand.u32 1, %s794_s11   ;;  %s670_s4 = scalar_lea.hbm %s1085_s1, 128 }
  0x18   : > { %p902_p7 = pnand %p595_p2, %p1097_p0  ;;  %p909_p3 = pnand %p608_p4, %p871_p5 }
  0x19   : > { %s563_s29 = sshll.u32 %s121_s27, 5  ;;  %p671_p8 = scmp.ne.s32.totalorder %s1085_s1, %s670_s4 }
  0x1a   : > { %s1099_s28 = scalar_select %p909_p3, 1, 0 }
  0x1b   : > { %p672_p9 = pneg %p902_p7  ;;  %p677_p4 = scmp.lt.u32.totalorder %s670_s4, %s1085_s1 }
  0x1d   : > { %p673_p10 = pnand %p672_p9, %p671_p8 }
  0x1f   : > { %p674_p2 = pneg %p673_p10 }
  0x21   : > { %p679_p5 = pnand %p677_p4, %p674_p2 }
  0x23   : > { %682 = shalt.err (!%p679_p5)
}
  0x24   : > { %s683_s14 = scalar_lea.vmem %s111_s25, 128  ;;  %p691_p11 = scmp.lt.s32.totalorder %s111_s25, %s111_s25 }
  0x25   : > { %p684_p0 = scmp.ne.s32.totalorder %s111_s25, %s683_s14  ;;  %p692_p6 = scmp.lt.s32.totalorder %s683_s14, %s683_s14 }
  0x27   : > { %p686_p1 = pnand %p684_p0, %p672_p9  ;;  %p693_p13 = por %p692_p6, %p691_p11 }
  0x29   : > { %p687_p12 = pneg %p686_p1 }
  0x2b   : > { %p694_p3 = pnand %p693_p13, %p687_p12 }
  0x2d   : > { %697 = shalt.err (!%p694_p3)
}
  0x2e   : > { %598 = dma.hbm_to_vmem [thread:$0]  (!%p902_p7), %s1085_s1, 128, %s111_s25, [#allocation6]  }
  0x2f   : > { %s585_s19 = sshll.u32 %s798_s12, 8  ;;  %s125_s24 = scalar_lea.vmem [#allocation2], %s563_s29 }
  0x30   : > { %s132_s30 = sshll.u32 %s125_s24, 4  ;;  %s933_s5 = scalar_lea.hbm %s1084_s0, %s585_s19  ;;  %s935_s30 = int_to_ptr.vmem [resolvable:$true] %s132_s30 }
  0x31   : > { %s937_s26 = scalar_lea.sflag [#allocation3], %s121_s27  ;;  %s698_s6 = scalar_lea.hbm %s933_s5, 512 }
  0x32   : > { %p699_p6 = scmp.ne.s32.totalorder %s933_s5, %s698_s6  ;;  %p1100_p11 = scmp.ne.s32.totalorder %s1099_s28, 0 }
  0x33   : > { %s703_s7 = scalar_lea.hbm %s1084_s0, 1024  ;;  %p704_p7 = scmp.lt.u32.totalorder %s933_s5, %s1084_s0 }
  0x34   : > { %p700_p12 = pneg %p1100_p11  ;;  %p705_p3 = scmp.lt.u32.totalorder %s703_s7, %s698_s6 }
  0x35   : > { %p707_p9 = scmp.lt.u32.totalorder %s698_s6, %s933_s5 }
  0x36   : > { %p701_p13 = pnand %p700_p12, %p699_p6  ;;  %p706_p8 = por %p705_p3, %p704_p7 }
  0x38   : > { %p702_p1 = pneg %p701_p13  ;;  %p708_p10 = por %p707_p9, %p706_p8 }
  0x3a   : > { %p709_p2 = pnand %p708_p10, %p702_p1 }
  0x3c   : > { %712 = shalt.err (!%p709_p2)
}
  0x3d   : > { %s713_s27 = scalar_lea.vmem %s935_s30, 512  ;;  %s801_s16 = smov [#allocation2]  }
  0x3e   : > { %p714_p4 = scmp.ne.s32.totalorder %s935_s30, %s713_s27  ;;  %s718_s17 = sshll.u32 %s801_s16, 4  ;;  %s719_s17 = int_to_ptr.vmem [resolvable:$false] %s718_s17 }
  0x3f   : > { %s720_s19 = scalar_lea.vmem %s719_s17, 1024  ;;  %p721_p6 = scmp.lt.s32.totalorder %s935_s30, %s719_s17 }
  0x40   : > { %p716_p5 = pnand %p714_p4, %p700_p12  ;;  %p722_p13 = scmp.lt.s32.totalorder %s720_s19, %s713_s27 }
  0x42   : > { %p717_p0 = pneg %p716_p5  ;;  %p723_p7 = por %p722_p13, %p721_p6 }
  0x44   : > { %p724_p3 = pnand %p723_p7, %p717_p0 }
  0x46   : > { %727 = shalt.err (!%p724_p3)
}
  0x47   : > { %s802_s24 = smov 512   ;;  %s803_s3 = smov 256  }
  0x48   : > { %s804_s4 = smov 16   ;;  %p1101_p12 = scmp.ne.s32.totalorder %s1096_s23, 0 }
  0x49   : > { %602 = dma.hbm_to_vmem [thread:$0]  (!%p1100_p11), %s933_s5, 512, %s935_s30, %s937_s26, %s802_s24, %s803_s3, %s804_s4  }
  0x4a   : > { %144 = sbr.rel (%p1101_p12) target bundleno = 281 (0x119), region = 28  ;;  %s968_s6 = sand.u32 (!%p1101_p12), 1, %s790_s10  }
  0x4b   : > { %s567_s25 = sshll.u32 (!%p1101_p12), %s968_s6, 5  ;;  %s147_s29 = scalar_lea.sflag (!%p1101_p12), [#allocation3], %s968_s6 }
  0x4c   : > { %s972_s7 = scalar_lea.vmem (!%p1101_p12), [#allocation2], %s567_s25  ;;  %p1102_p1 = scmp.ne.s32.totalorder (!%p1101_p12), %s1093_s20, 0 }
  0x51   : > { %773 = dma.done.wait (%p1102_p1), %s147_s29, 512  }
  0x52   : > { %775 = vsyncadd (%p1102_p1), %s147_s29, 4294966784  ;;  %p1103_p11 = scmp.eq.s32.totalorder %s853_s13, 0 }
  0x54   : > { %777 = dma.done.wait (%p1103_p11), [#allocation6], 128   ;;  %p1104_p8 = pmov %p1103_p11 }
  0x55   : > { %v805_v0 = vmov 0   ;;  %v806_v1 = vmov 7   ;;  %v177_v2 = vld [vmem:[#allocation5] sm:$0x3f]  ;;  %v807_v3 = vmov 1   ;;  %v808_v4 = vmov 8  }
  0x56   : > { %779 = vsyncadd (%p1104_p8), [#allocation6], 4294967168  ;;  %660 = vset.pattern.permute.xlu1 %v805_v0  ;;  %658 = vset.pattern.permute.xlu0 %v806_v1  ;;  %668 = vrcp.f32 %v177_v2  ;;  %v809_v5 = vmov 2   ;;  %v810_v6 = vmov 3   ;;  %v811_v8 = vmov 4   ;;  %s569_s20 = sshll.u32 %s968_s6, 4 }
  0x57   : > { %212 = vperm.xlu1 %660, %v177_v2   ;;  %187 = vperm.xlu0 %658, %v177_v2   ;;  %v812_v9 = vmov 6   ;;  %v813_v10 = vmov 5   ;;  %v191_v11 = vlaneseq  ;;  %v571_v13 = vld [vmem:[%s972_s7 + $0x2] ss:$8 sm:$0x3]  ;;  %s174_s23 = scalar_lea.vmem [#allocation7], %s569_s20 }
  0x58   : > { %v574_v20 = vld [vmem:[%s972_s7 + $0x5] ss:$8 sm:$0x3]  ;;  %v573_v21 = vld [vmem:[%s972_s7 + $0x4] ss:$8 sm:$0x3] }
  0x59   : > { %v983_v12 = vshrl.u32 %v191_v11, 7  ;;  %v575_v28 = vld [vmem:[%s972_s7 + $0x6] ss:$8 sm:$0x3]  ;;  %v814_v61 = vmov 1966171168  }
  0x5a   : > { %v576_v35 = vld [vmem:[%s972_s7 + $0x7] ss:$8 sm:$0x3]  ;;  %v570_v42 = vld [vmem:[%s972_s7 + $0x1] ss:$8 sm:$0x3]  ;;  %v342_v62 = vunpack.c.l.s4 %v814_v61 }
  0x5b   : > { %661 = vset.pattern.permute.xlu1 %v807_v3  ;;  %659 = vset.pattern.permute.xlu0 %v808_v4  ;;  %v987_v14 = vsub.s32 0, %v983_v12  ;;  %v990_v15 = vsub.s32 1, %v983_v12  ;;  %v577_v45 = vld [vmem:[%s972_s7 + $0x10] ss:$8 sm:$0x3]  ;;  %v336_v52 = vsub.f32 %v570_v42, %v573_v21  ;;  %s586_s28 = sshll.u32 %s853_s13, 8 }
  0x5c   : > { %233 = vperm.xlu1 %661, %v177_v2   ;;  %204 = vperm.xlu0 %659, %v177_v2   ;;  %v578_v59 = vld [vmem:[%s972_s7 + $0x11] ss:$8 sm:$0x3]  ;;  %s479_s30 = sshll.u32 %s174_s23, 4  ;;  %vm460_vm1 = vcmp.lt.s32.totalorder %v191_v11, 256  ;;  %s1039_s8 = scalar_lea.hbm %s1086_s2, %s586_s28  ;;  %s1041_s30 = int_to_ptr.vmem [resolvable:$true] %s479_s30 }
  0x5d   : > { %v194_v16 = vrot.slane %v571_v13, %v987_v14  ;;  %v198_v17 = vrot.slane %v571_v13, %v990_v15  ;;  %v219_v24 = vrot.slane %v573_v21, %v987_v14  ;;  %v223_v25 = vrot.slane %v573_v21, %v990_v15  ;;  %s465_s14 = scalar_lea.sflag [#allocation4], %s968_s6  ;;  %s728_s27 = scalar_lea.vmem %s1041_s30, 256 }
  0x5e   : > { %v240_v26 = vrot.slane %v574_v20, %v987_v14  ;;  %v244_v27 = vrot.slane %v574_v20, %v990_v15  ;;  %v261_v36 = vrot.slane %v575_v28, %v987_v14  ;;  %v265_v37 = vrot.slane %v575_v28, %v990_v15  ;;  %v178_v28 = vld [vmem:[%s972_s7] ss:$8 sm:$0x3]  ;;  %p729_p9 = scmp.ne.s32.totalorder %s1041_s30, %s728_s27  ;;  %p1105_p10 = scmp.ne.s32.totalorder %s1094_s21, 0 }
  0x5f   : > { %v282_v43 = vrot.slane %v576_v35, %v987_v14  ;;  %v286_v44 = vrot.slane %v576_v35, %v990_v15  ;;  %v303_v53 = vrot.slane %v577_v45, %v987_v14  ;;  %v307_v54 = vrot.slane %v577_v45, %v990_v15  ;;  %s816_s13 = smov [#allocation7]  }
  0x60   : > { %662 = vset.pattern.permute.xlu1 %v809_v5  ;;  %663 = vset.pattern.permute.xlu0 %v810_v6  ;;  %v669_v7 = vpop.eup %668  ;;  %v361_v63 = vrot.slane %v336_v52, %v987_v14  ;;  %v365_v0 = vrot.slane %v336_v52, %v990_v15  ;;  %v324_v1 = vrot.slane %v578_v59, %v987_v14  ;;  %p730_p2 = pnand %p729_p9, %p1105_p10  ;;  %s732_s16 = sshll.u32 %s816_s13, 4  ;;  %s733_s16 = int_to_ptr.vmem [resolvable:$false] %s732_s16 }
  0x61   : > { %254 = vperm.xlu1 %662, %v177_v2   ;;  %275 = vperm.xlu0 %663, %v177_v2   ;;  %s734_s17 = scalar_lea.vmem %s733_s16, 512  ;;  %p735_p5 = scmp.lt.s32.totalorder %s1041_s30, %s733_s16 }
  0x62   : > { %p731_p4 = pneg %p730_p2  ;;  %p736_p0 = scmp.lt.s32.totalorder %s734_s17, %s728_s27 }
  0x64   : > { %p737_p6 = por %p736_p0, %p735_p5 }
  0x65   : > { %664 = vset.pattern.permute.xlu1 %v811_v8  ;;  %666 = vset.pattern.permute.xlu0 %v812_v9 }
  0x66   : > { %296 = vperm.xlu1 %664, %v177_v2   ;;  %391 = vperm.xlu0 %666, %v669_v7   ;;  %v343_v7 = vunpack.c.0.s8 %v342_v62  ;;  %p738_p13 = pnand %p737_p6, %p731_p4 }
  0x68   : > { %v346_v20 = vsub.s32 %v343_v7, %v983_v12 }
  0x6a   : > { %665 = vset.pattern.permute.xlu1 %v813_v10 }
  0x6b   : > { %317 = vperm.xlu1 %665, %v177_v2  }
  0x6f   : > { %667 = vset.pattern.permute.xlu1 %v812_v9 }
  0x70   : > { %403 = vperm.xlu1 %667, %v177_v2   ;;  %v328_v2 = vrot.slane %v578_v59, %v990_v15 }
  0xd6   : > { %v994_v18 = vpop.permute.xlu1 %212  ;;  %v188_v19 = vpop.permute.xlu0 %187 }
  0xd7   : > { %v201_v22 = vmul.f32 %v194_v16, %v188_v19  ;;  %v202_v23 = vmul.f32 %v198_v17, %v188_v19  ;;  %v226_v31 = vmul.f32 %v219_v24, %v994_v18  ;;  %v227_v32 = vmul.f32 %v223_v25, %v994_v18  ;;  %v572_v25 = vld [vmem:[%s972_s7 + $0x3] ss:$8 sm:$0x3] }
  0xd8   : > { %v368_v8 = vmul.f32 %v361_v63, %v994_v18  ;;  %v369_v9 = vmul.f32 %v365_v0, %v994_v18  ;;  %vm335_vm0 = vcmp.gt.f32.partialorder %v572_v25, 0.5 }
  0xdb   : > { %v234_v29 = vpop.permute.xlu1 %233  ;;  %v205_v30 = vpop.permute.xlu0 %204 }
  0xdc   : > { %v207_v33 = vadd.f32 %v205_v30, %v201_v22  ;;  %v208_v34 = vadd.f32 %v205_v30, %v202_v23  ;;  %v247_v38 = vmul.f32 %v240_v26, %v234_v29  ;;  %v248_v39 = vmul.f32 %v244_v27, %v234_v29 }
  0xdd   : > { %v372_v23 = vcombine.low %v368_v8, %v369_v9 }
  0xde   : > { %v228_v40 = vadd.f32 %v226_v31, %v207_v33  ;;  %v229_v41 = vadd.f32 %v227_v32, %v208_v34  ;;  %v815_v34 = vmov 0.0  }
  0xdf   : > { %v379_v27 = vrot.slane %v372_v23, %v346_v20  ;;  %v579_v35 = vsel %vm335_vm0, 1.0, %v815_v34 }
  0xe0   : > { %v255_v46 = vpop.permute.xlu1 %254  ;;  %v249_v47 = vadd.f32 %v247_v38, %v228_v40  ;;  %v250_v48 = vadd.f32 %v248_v39, %v229_v41  ;;  %v276_v49 = vpop.permute.xlu0 %275 }
  0xe1   : > { %v268_v50 = vmul.f32 %v261_v36, %v255_v46  ;;  %v269_v51 = vmul.f32 %v265_v37, %v255_v46  ;;  %v289_v57 = vmul.f32 %v282_v43, %v276_v49  ;;  %v290_v58 = vmul.f32 %v286_v44, %v276_v49 }
  0xe2   : > { %v386_v32 = vrot.slane %v379_v27, %v346_v20  ;;  %v421_v36 = vmul.f32 %v579_v35, %v336_v52 }
  0xe3   : > { %v270_v55 = vadd.f32 %v268_v50, %v249_v47  ;;  %v271_v56 = vadd.f32 %v269_v51, %v250_v48 }
  0xe4   : > { %v426_v40 = vrot.slane %v421_v36, %v987_v14  ;;  %v430_v41 = vrot.slane %v421_v36, %v990_v15 }
  0xe5   : > { %v297_v60 = vpop.permute.xlu1 %296  ;;  %v291_v3 = vadd.f32 %v289_v57, %v270_v55  ;;  %v292_v4 = vadd.f32 %v290_v58, %v271_v56  ;;  %v392_v29 = vpop.permute.xlu0 %391 }
  0xe6   : > { %v310_v5 = vmul.f32 %v303_v53, %v297_v60  ;;  %v311_v6 = vmul.f32 %v307_v54, %v297_v60  ;;  %v396_v33 = vrot.slane %v392_v29, %v987_v14  ;;  %v433_v46 = vmul.f32 %v426_v40, %v994_v18 }
  0xe7   : > { %v434_v47 = vmul.f32 %v430_v41, %v994_v18 }
  0xe8   : > { %v312_v13 = vadd.f32 %v310_v5, %v291_v3  ;;  %v313_v16 = vadd.f32 %v311_v6, %v292_v4 }
  0xea   : > { %v318_v10 = vpop.permute.xlu1 %317 }
  0xeb   : > { %v331_v17 = vmul.f32 %v324_v1, %v318_v10  ;;  %v332_v19 = vmul.f32 %v328_v2, %v318_v10 }
  0xed   : > { %v333_v21 = vadd.f32 %v331_v17, %v312_v13  ;;  %v334_v22 = vadd.f32 %v332_v19, %v313_v16 }
  0xef   : > { %v340_v24 = vcombine.low %v333_v21, %v334_v22  ;;  %v404_v38 = vpop.permute.xlu1 %403 }
  0xf1   : > { %v347_v26 = vrot.slane %v340_v24, %v346_v20 }
  0xf3   : > { %v354_v30 = vrot.slane %v347_v26, %v346_v20 }
  0xf5   : > { %v356_v31 = vsub.f32 %v178_v28, %v354_v30 }
  0xf7   : > { %v388_v12 = vsub.f32 %v356_v31, %v386_v32 }
  0xf9   : > { %v398_v37 = vmul.f32 %v396_v33, %v388_v12 }
  0xfb   : > { %v399_v39 = vsel %vm335_vm0, %v398_v37, %v178_v28 }
  0xfc   : > { %v410_v42 = vrot.slane %v399_v39, %v987_v14  ;;  %v414_v43 = vrot.slane %v399_v39, %v990_v15 }
  0xfe   : > { %v417_v44 = vmul.f32 %v410_v42, %v404_v38  ;;  %v418_v45 = vmul.f32 %v414_v43, %v404_v38 }
 0x100   : > { %v419_v48 = vadd.f32 %v417_v44, %v333_v21  ;;  %v420_v49 = vadd.f32 %v418_v45, %v334_v22 }
 0x102   : > { %v435_v50 = vadd.f32 %v433_v46, %v419_v48  ;;  %v436_v51 = vadd.f32 %v434_v47, %v420_v49 }
 0x104   : > { %437 = vst [vmem:[%s174_s23] sm:$0x3f] %v435_v50  ;;  %438 = vst [vmem:[%s174_s23 + $0x8] sm:$0x3f] %v436_v51  ;;  %v441_v14 = vcombine.low %v435_v50, %v436_v51 }
 0x106   : > { %v448_v52 = vrot.slane %v441_v14, %v346_v20 }
 0x108   : > { %v455_v15 = vrot.slane %v448_v52, %v346_v20 }
 0x10a   : > { %v457_v18 = vsel %vm335_vm0, %v398_v37, %v455_v15 }
 0x10b   : > { %462 = vst.msk [vmem:[%s174_s23] ss:$8 sm:$0x3] %vm460_vm1, %v457_v18 }
 0x10c   : > { %741 = shalt.err (!%p738_p13)
}
 0x10d   : > { %s742_s19 = scalar_lea.hbm %s1039_s8, 256  ;;  %s746_s4 = scalar_lea.hbm %s1086_s2, 512 }
 0x10e   : > { %p743_p7 = scmp.ne.s32.totalorder %s1039_s8, %s742_s19  ;;  %p747_p1 = scmp.lt.u32.totalorder %s1039_s8, %s1086_s2 }
 0x10f   : > { %p748_p11 = scmp.lt.u32.totalorder %s746_s4, %s742_s19  ;;  %p750_p9 = scmp.lt.u32.totalorder %s742_s19, %s1039_s8 }
 0x110   : > { %p744_p3 = pnand %p743_p7, %p1105_p10 }
 0x111   : > { %p749_p8 = por %p748_p11, %p747_p1 }
 0x112   : > { %p745_p12 = pneg %p744_p3 }
 0x113   : > { %p751_p2 = por %p750_p9, %p749_p8 }
 0x115   : > { %p752_p4 = pnand %p751_p2, %p745_p12 }
 0x117   : > { %755 = shalt.err (!%p752_p4)
}
 0x118   : > { %593 = dma.vmem_to_hbm [thread:$0]  (%p1105_p10), %s1041_s30, 256, %s1039_s8, %s465_s14  }
 0x119 PF: > { %s491_s29 = sand.u32 1, %s786_s9   ;;  %p1106_p5 = scmp.ne.s32.totalorder %s1095_s22, 0 }
 0x11a   : > { %p1107_p0 = scmp.ge.s32.totalorder %s798_s12, 2  ;;  %s492_s7 = scalar_lea.sflag [#allocation4], %s491_s29 }
 0x11c   : > { %p604_p6 = pnand %p1107_p0, %p1106_p5 }
 0x11e   : > { %781 = dma.done.wait (!%p604_p6), %s492_s7, 256  }
 0x11f   : > { %783 = vsyncadd (!%p604_p6), %s492_s7, 4294967040  ;;  %p16_p13 = scmp.ge.s32.totalorder %s857_s15, 4   ;;  %s1108_s9 = smov %s790_s10 }
 0x120   : > { %s1109_s10 = smov %s794_s11  ;;  %s1110_s11 = smov %s869_s18 }
 0x121   : > { %s1111_s12 = smov %s857_s15  ;;  %18 = sbr.rel (!%p16_p13) target bundleno = 6 (0x6), region = 86 }
 0x128   :  { %497 = vsyncpa [#allocation3], 1 }
 0x129   :  { %499 = vsyncpa [#allocation3 + $0x1], 1 }
 0x12a   :  { %500 = vsyncpa [#allocation6], 1 }
 0x12b   :  { %501 = vsyncpa [#allocation4], 1 }
 0x12c   :  { %503 = vsyncpa [#allocation4 + $0x1], 1 }

</bundles_post_ra>
